<compile_context>
chip_gen: v5e
topology: v5e:2x2
jax: 0.10.0
libtpu: 0.0.40
codegen_flags: <defaults>
</compile_context>

<pallas_src>
import math

import jax
import jax.numpy as jnp
from jax.experimental import pallas as pl
from jax.experimental.pallas import tpu as pltpu


# GELU-tanh constants (0.044715 folded into the 0.7978845608028654 scale).
_C3 = 0.7978845608028654
_C3A = _C3 * 0.044715


def gelu_linear_kernel(xp_ref, wp_ref, bp_ref, o_ref):
    # xp_ref: (rows, PACK*K)   packed input row tile
    # wp_ref: (PACK*K, PACK*N) block-diagonal kron(I_PACK, W), resident
    # bp_ref: (1, PACK*N)      bias tiled PACK times, resident
    # o_ref : (rows, PACK*N)   lane-dense packed output tile
    y = jnp.dot(xp_ref[...], wp_ref[...], preferred_element_type=jnp.float32)
    y = y + bp_ref[...]                       # v1 = linear(x)   (packed layout)
    inner = y * (_C3 + _C3A * (y * y))        # (y + 0.044715*y^3) * 0.79788456
    # v7 = (0.5*y) * (tanh(inner) + 1)
    o_ref[...] = ((0.5 * y) * (1.0 + jnp.tanh(inner))).astype(o_ref.dtype)


def _round_up(x, m):
    return ((x + m - 1) // m) * m


def _select_pack(n):
    """Rows packed per 128-lane output row. Disabled on v5e (MXU headroom)."""
    if n > 128 or 128 % n != 0:
        return 1
    try:
        kind = jax.devices()[0].device_kind.lower()
    except Exception:  # pragma: no cover - detection is best-effort only
        kind = ""
    if "v5 lite" in kind or "v5e" in kind or "v5lite" in kind:
        return 1      # keep v5e memory-bound: no 8x MAC inflation
    return 128 // n


def make_gelu_linear(w, b, *, tm_target=16384):
    """Returns fn(x) computing GELU_tanh(x @ w + b); w: (K,N), b: (N,)."""
    K, N = w.shape
    assert b.shape == (N,)
    PACK = _select_pack(N)

    w32 = jnp.asarray(w, jnp.float32)
    b32 = jnp.asarray(b, jnp.float32)
    if PACK > 1:
        # Built once and closed over (review item: no per-call kron/tile).
        wp = jnp.kron(jnp.eye(PACK, dtype=jnp.float32), w32)   # (PACK*K, PACK*N)
        bp = jnp.tile(b32, PACK).reshape(1, PACK * N)
    else:
        wp = w32
        bp = b32.reshape(1, N)

    bytes_per_packed_row = PACK * K * 4
    # Floor: ~1 MiB of input per grid step so the 0.35 us/step overhead is
    # amortized.  Target: ~tm_target logical rows (~4 MiB/step).
    min_rows = _round_up(pl.cdiv(1 << 20, bytes_per_packed_row), 8)
    rows_target = max(8, _round_up(max(tm_target, 1) // PACK, 8))

    def _apply(x):
        *lead, K2 = x.shape
        assert K2 == K
        M = math.prod(lead) if lead else 1
        x2 = jnp.asarray(x, jnp.float32).reshape(M, K)

        # Pad only to the packing factor (<= PACK-1 rows), never to the tile.
        M_pad = _round_up(max(M, 1), PACK)
        if M_pad != M:
            x2 = jnp.pad(x2, ((0, M_pad - M), (0, 0)))
        pm = M_pad // PACK                         # packed rows
        xp = x2.reshape(pm, PACK * K)              # free, contiguous reshape

        # Rows per grid step: aim for >= 4 tiles on large inputs (so v7x's two
        # TensorCores both get work), never below ~1 MiB/step, never above the
        # target tile; Pallas masks the ragged last block.
        rows = min(rows_target, max(min_rows, _round_up(pl.cdiv(pm, 4), 8)))
        rows = max(8, min(rows, _round_up(pm, 8)))
        grid = (pl.cdiv(pm, rows),)

        # Scoped VMEM: double-buffered in/out tiles + resident weight/bias.
        in_bytes = rows * PACK * K * 4
        out_bytes = rows * PACK * N * 4
        wgt_bytes = wp.size * 4 + bp.size * 4
        vmem_limit = int(min(48 << 20,
                             max(24 << 20,
                                 2 * (in_bytes + out_bytes) + 2 * wgt_bytes + (4 << 20))))

        out_packed = pl.pallas_call(
            gelu_linear_kernel,
            out_shape=jax.ShapeDtypeStruct((pm, PACK * N), jnp.float32),
            grid=grid,
            in_specs=[
                pl.BlockSpec((rows, PACK * K), lambda i: (i, 0)),      # streamed rows
                pl.BlockSpec((PACK * K, PACK * N), lambda i: (0, 0)),  # W resident
                pl.BlockSpec((1, PACK * N), lambda i: (0, 0)),         # bias resident
            ],
            out_specs=pl.BlockSpec((rows, PACK * N), lambda i: (i, 0)),
            compiler_params=pltpu.CompilerParams(
                dimension_semantics=("parallel",),   # megacore sharding on v7x
                vmem_limit_bytes=vmem_limit),
        )(xp, wp, bp)

        out = out_packed.reshape(M_pad, N)           # free reshape
        if M_pad != M:
            out = out[:M]                            # only when M is ragged
        return out.reshape(*lead, N)

    return jax.jit(_apply)


def _gelu_ref(x, w, b):
    y = x @ w + b
    return (y * 0.5) * (jnp.tanh((y + y * y * y * 0.044715) * 0.7978845608028654) + 1.0)


if __name__ == "__main__":
    key = jax.random.PRNGKey(0)
    kx, kw, kb, kl = jax.random.split(key, 4)

    IN_FEATURES, OUT_FEATURES = 64, 16
    # Channels-last layout consistent with Linear(64, 16) over the last axis.
    x = jax.random.normal(kx, (1, 3, 5, IN_FEATURES), dtype=jnp.float32)

    # nn.Linear-style init: uniform(-1/sqrt(K), 1/sqrt(K))
    bound = 1.0 / (IN_FEATURES ** 0.5)
    w = jax.random.uniform(kw, (IN_FEATURES, OUT_FEATURES), jnp.float32, -bound, bound)
    b = jax.random.uniform(kb, (OUT_FEATURES,), jnp.float32, -bound, bound)

    gelu_linear = make_gelu_linear(w, b)

    out = gelu_linear(x)
    jax.block_until_ready(out)
    assert out.shape == (1, 3, 5, OUT_FEATURES)
    assert jnp.allclose(out, _gelu_ref(x, w, b), atol=2e-5, rtol=2e-5)

    # Multi-tile path: grid of several row tiles with a ragged last block and
    # a non-multiple-of-PACK row count (exercises the minimal-padding path).
    xl = jax.random.normal(kl, (8195, IN_FEATURES), dtype=jnp.float32)
    outl = gelu_linear(xl)
    jax.block_until_ready(outl)
    assert outl.shape == (8195, OUT_FEATURES)
    assert jnp.allclose(outl, _gelu_ref(xl, w, b), atol=1e-4, rtol=1e-4)

    print("KERNEL_OK")
</pallas_src>

<mosaic_0001>
module attributes {stable_mosaic.version = 11 : i64} {
  func.func @gelu_linear_kernel(%arg0: i32, %arg1: memref<8x512xf32, #tpu.memory_space<vmem>>, %arg2: memref<512x128xf32, #tpu.memory_space<vmem>>, %arg3: memref<1x128xf32, #tpu.memory_space<vmem>>, %arg4: memref<8x128xf32, #tpu.memory_space<vmem>>) attributes {dimension_semantics = [#tpu.dimension_semantics<parallel>], iteration_bounds = array<i64: 1>, scalar_prefetch = 0 : i64, scratch_operands = 0 : i64, tpu.core_type = #tpu.core_type<tc>, window_params = [{transform_indices = @transform_0, window_bounds = array<i64: 8, 512>}, {pipeline_mode = #tpu.pipeline_mode<synchronous>, transform_indices = @transform_1, window_bounds = array<i64: 512, 128>}, {pipeline_mode = #tpu.pipeline_mode<synchronous>, transform_indices = @transform_2, window_bounds = array<i64: 1, 128>}, {transform_indices = @transform_3, window_bounds = array<i64: 8, 128>}]} {
    %c0 = arith.constant 0 : index
    %c0_0 = arith.constant 0 : index
    %0 = vector.load %arg1[%c0, %c0_0] : memref<8x512xf32, #tpu.memory_space<vmem>>, vector<8x512xf32>
    %c0_1 = arith.constant 0 : index
    %c0_2 = arith.constant 0 : index
    %1 = vector.load %arg2[%c0_1, %c0_2] : memref<512x128xf32, #tpu.memory_space<vmem>>, vector<512x128xf32>
    %cst = arith.constant dense<0.000000e+00> : vector<8x128xf32>
    %2 = tpu.matmul %0, %1, %cst {dimension_numbers = #tpu.dot_dimension_numbers<[1], [0], [0], [1], [0, 0, 1, 1], [], []>} : vector<8x512xf32>, vector<512x128xf32>, vector<8x128xf32> -> vector<8x128xf32>
    %c0_3 = arith.constant 0 : index
    %c0_4 = arith.constant 0 : index
    %3 = vector.load %arg3[%c0_3, %c0_4] : memref<1x128xf32, #tpu.memory_space<vmem>>, vector<1x128xf32>
    %4 = vector.broadcast %3 : vector<1x128xf32> to vector<8x128xf32>
    %5 = arith.addf %2, %4 : vector<8x128xf32>
    %6 = arith.mulf %5, %5 : vector<8x128xf32>
    %cst_5 = arith.constant 0.0356774069 : f32
    %7 = vector.broadcast %cst_5 : f32 to vector<8x128xf32>
    %8 = arith.mulf %7, %6 : vector<8x128xf32>
    %cst_6 = arith.constant 0.797884583 : f32
    %9 = vector.broadcast %cst_6 : f32 to vector<8x128xf32>
    %10 = arith.addf %9, %8 : vector<8x128xf32>
    %11 = arith.mulf %5, %10 : vector<8x128xf32>
    %cst_7 = arith.constant 5.000000e-01 : f32
    %12 = vector.broadcast %cst_7 : f32 to vector<8x128xf32>
    %13 = arith.mulf %12, %5 : vector<8x128xf32>
    %14 = math.tanh %11 : vector<8x128xf32>
    %cst_8 = arith.constant 1.000000e+00 : f32
    %15 = vector.broadcast %cst_8 : f32 to vector<8x128xf32>
    %16 = arith.addf %15, %14 : vector<8x128xf32>
    %17 = arith.mulf %13, %16 : vector<8x128xf32>
    %c0_9 = arith.constant 0 : index
    %c0_10 = arith.constant 0 : index
    %18 = vector.load %arg4[%c0_9, %c0_10] : memref<8x128xf32, #tpu.memory_space<vmem>>, vector<8x128xf32>
    tpu.vector_store %arg4[%c0_9, %c0_10], %17 {strides = array<i32>} : memref<8x128xf32, #tpu.memory_space<vmem>>, vector<8x128xf32>,
    return
  }
  func.func @transform_0(%arg0: i32) -> (i32, i32) {
    %c0_i32 = arith.constant 0 : i32
    %c0_i32_0 = arith.constant 0 : i32
    return %arg0, %c0_i32 : i32, i32
  }
  func.func @transform_1(%arg0: i32) -> (i32, i32) {
    %c0_i32 = arith.constant 0 : i32
    %c0_i32_0 = arith.constant 0 : i32
    %c0_i32_1 = arith.constant 0 : i32
    return %c0_i32, %c0_i32_0 : i32, i32
  }
  func.func @transform_2(%arg0: i32) -> (i32, i32) {
    %c0_i32 = arith.constant 0 : i32
    %c0_i32_0 = arith.constant 0 : i32
    %c0_i32_1 = arith.constant 0 : i32
    return %c0_i32, %c0_i32_0 : i32, i32
  }
  func.func @transform_3(%arg0: i32) -> (i32, i32) {
    %c0_i32 = arith.constant 0 : i32
    %c0_i32_0 = arith.constant 0 : i32
    return %arg0, %c0_i32 : i32, i32
  }
}

</mosaic_0001>

<bundles_post_ra>
// kernel: _apply.1
= control target key start
LH: loop header
LB: loop body
LE: loop exit
PB: predicated region body
PF: predicated region fallthrough
CT: control target
= control target key end

     0   :  { %8 = vsyncpa [#allocation3], 0  ;;  %s284_s15 = smov [#allocation2]   ;;  %s285_s17 = smov 128   ;;  %s328_s0 = inlined_call_operand.vmem [shape: f32[2,512], index: 0, kind: input, shape index: {}]   ;;  %s329_s1 = inlined_call_operand.hbm [shape: f32[512,128], index: 1, kind: input, shape index: {}]   ;;  %s330_s2 = inlined_call_operand.vmem [shape: f32[1,128], index: 2, kind: input, shape index: {}]   ;;  %s331_s3 = inlined_call_operand.vmem [shape: f32[2,128], index: 3, kind: output, shape index: {}]  }
   0x1   :  { %s15_s14 = sshll.u32 %s329_s1, 4  ;;  %s17_s16 = sshll.u32 %s284_s15, 4  ;;  %s16_s14 = int_to_ptr.hbm [resolvable:$true] %s15_s14  ;;  %s18_s16 = int_to_ptr.vmem [resolvable:$true] %s17_s16 }
   0x2   :  { %s286_s18 = smov 8  }
   0x3   :  { %23 = dma.hbm_to_vmem [thread:$0]  %s16_s14, 8192, %s18_s16, [#allocation3], %s285_s17, %s285_s17, %s286_s18  }
   0x4   :  { %282 = dma.done.wait [#allocation3], 8192  }
   0x5   :  { %283 = vsyncadd [#allocation3], 4294959104  ;;  %v81_v0 = vld [vmem:[#allocation2 + $0x178] sm:$0xff]  ;;  %v80_v2 = vld [vmem:[#allocation2 + $0x170] sm:$0xff] }
   0x6   :  { %v49_v1 = vld [vmem:[#allocation2 + $0x78] sm:$0xff]  ;;  %161 = vmatpush.msra.mxu2 %v81_v0  ;;  %v48_v4 = vld [vmem:[#allocation2 + $0x70] sm:$0xff]  ;;  %v79_v6 = vld [vmem:[#allocation2 + $0x168] sm:$0xff] }
   0x7   :  { %121 = vmatpush.msra.mxu0 %v49_v1  ;;  %v97_v3 = vld [vmem:[#allocation2 + $0x1f8] sm:$0xff]  ;;  %v96_v7 = vld [vmem:[#allocation2 + $0x1f0] sm:$0xff]  ;;  %v47_v8 = vld [vmem:[#allocation2 + $0x68] sm:$0xff] }
   0x8   :  { %v65_v5 = vld [vmem:[#allocation2 + $0xf8] sm:$0xff]  ;;  %181 = vmatpush.msra.mxu3 %v97_v3  ;;  %162 = vmatpush.msra.mxu2 %v80_v2  ;;  %v64_v9 = vld [vmem:[#allocation2 + $0xf0] sm:$0xff]  ;;  %v95_v10 = vld [vmem:[#allocation2 + $0x1e8] sm:$0xff] }
   0x9   :  { %141 = vmatpush.msra.mxu1 %v65_v5  ;;  %122 = vmatpush.msra.mxu0 %v48_v4  ;;  %v78_v11 = vld [vmem:[#allocation2 + $0x160] sm:$0xff]  ;;  %v63_v13 = vld [vmem:[#allocation2 + $0xe8] sm:$0xff]  ;;  %v77_v16 = vld [vmem:[#allocation2 + $0x158] sm:$0xff] }
   0xa   :  { %182 = vmatpush.msra.mxu3 %v96_v7  ;;  %v46_v12 = vld [vmem:[#allocation2 + $0x60] sm:$0xff]  ;;  %163 = vmatpush.msra.mxu2 %v79_v6  ;;  %v45_v17 = vld [vmem:[#allocation2 + $0x58] sm:$0xff]  ;;  %v76_v20 = vld [vmem:[#allocation2 + $0x150] sm:$0xff] }
   0xb   :  { %142 = vmatpush.msra.mxu1 %v64_v9  ;;  %123 = vmatpush.msra.mxu0 %v47_v8  ;;  %v94_v14 = vld [vmem:[#allocation2 + $0x1e0] sm:$0xff]  ;;  %v93_v18 = vld [vmem:[#allocation2 + $0x1d8] sm:$0xff]  ;;  %v44_v21 = vld [vmem:[#allocation2 + $0x50] sm:$0xff] }
   0xc   :  { %v62_v15 = vld [vmem:[#allocation2 + $0xe0] sm:$0xff]  ;;  %183 = vmatpush.msra.mxu3 %v95_v10  ;;  %164 = vmatpush.msra.mxu2 %v78_v11  ;;  %v61_v19 = vld [vmem:[#allocation2 + $0xd8] sm:$0xff]  ;;  %v92_v22 = vld [vmem:[#allocation2 + $0x1d0] sm:$0xff] }
   0xd   :  { %143 = vmatpush.msra.mxu1 %v63_v13  ;;  %124 = vmatpush.msra.mxu0 %v46_v12  ;;  %v60_v23 = vld [vmem:[#allocation2 + $0xd0] sm:$0xff]  ;;  %v75_v24 = vld [vmem:[#allocation2 + $0x148] sm:$0xff]  ;;  %v74_v28 = vld [vmem:[#allocation2 + $0x140] sm:$0xff] }
   0xe   :  { %184 = vmatpush.msra.mxu3 %v94_v14  ;;  %165 = vmatpush.msra.mxu2 %v77_v16  ;;  %v43_v25 = vld [vmem:[#allocation2 + $0x48] sm:$0xff]  ;;  %v42_v29 = vld [vmem:[#allocation2 + $0x40] sm:$0xff]  ;;  %v73_v32 = vld [vmem:[#allocation2 + $0x138] sm:$0xff] }
   0xf   :  { %144 = vmatpush.msra.mxu1 %v62_v15  ;;  %125 = vmatpush.msra.mxu0 %v45_v17  ;;  %v91_v26 = vld [vmem:[#allocation2 + $0x1c8] sm:$0xff]  ;;  %v90_v30 = vld [vmem:[#allocation2 + $0x1c0] sm:$0xff]  ;;  %v41_v33 = vld [vmem:[#allocation2 + $0x38] sm:$0xff] }
  0x10   :  { %185 = vmatpush.msra.mxu3 %v93_v18  ;;  %166 = vmatpush.msra.mxu2 %v76_v20  ;;  %v59_v27 = vld [vmem:[#allocation2 + $0xc8] sm:$0xff]  ;;  %v58_v31 = vld [vmem:[#allocation2 + $0xc0] sm:$0xff]  ;;  %v89_v34 = vld [vmem:[#allocation2 + $0x1b8] sm:$0xff] }
  0x11   :  { %145 = vmatpush.msra.mxu1 %v61_v19  ;;  %126 = vmatpush.msra.mxu0 %v44_v21  ;;  %v57_v35 = vld [vmem:[#allocation2 + $0xb8] sm:$0xff]  ;;  %v72_v36 = vld [vmem:[#allocation2 + $0x130] sm:$0xff]  ;;  %v71_v40 = vld [vmem:[#allocation2 + $0x128] sm:$0xff] }
  0x12   :  { %186 = vmatpush.msra.mxu3 %v92_v22  ;;  %167 = vmatpush.msra.mxu2 %v75_v24  ;;  %v40_v37 = vld [vmem:[#allocation2 + $0x30] sm:$0xff]  ;;  %v39_v41 = vld [vmem:[#allocation2 + $0x28] sm:$0xff]  ;;  %v70_v42 = vld [vmem:[#allocation2 + $0x120] sm:$0xff] }
  0x13   :  { %146 = vmatpush.msra.mxu1 %v60_v23  ;;  %127 = vmatpush.msra.mxu0 %v43_v25  ;;  %v88_v38 = vld [vmem:[#allocation2 + $0x1b0] sm:$0xff]  ;;  %v87_v43 = vld [vmem:[#allocation2 + $0x1a8] sm:$0xff]  ;;  %v38_v44 = vld [vmem:[#allocation2 + $0x20] sm:$0xff] }
  0x14   :  { %187 = vmatpush.msra.mxu3 %v91_v26  ;;  %168 = vmatpush.msra.mxu2 %v74_v28  ;;  %v56_v39 = vld [vmem:[#allocation2 + $0xb0] sm:$0xff]  ;;  %v55_v45 = vld [vmem:[#allocation2 + $0xa8] sm:$0xff]  ;;  %v30_v46 = vld [vmem:[%s328_s0] sm:$0xff] }
  0x15   :  { %147 = vmatpush.msra.mxu1 %v59_v27  ;;  %128 = vmatpush.msra.mxu0 %v42_v29  ;;  %v31_v47 = vld [vmem:[%s328_s0 + $0x8] sm:$0xff]  ;;  %v32_v48 = vld [vmem:[%s328_s0 + $0x10] sm:$0xff]  ;;  %v33_v51 = vld [vmem:[%s328_s0 + $0x18] sm:$0xff]  ;;  %106 = vst [vmem:[#allocation1] ss:$4 sm:$0xff] %v30_v46 }
  0x16   :  { %188 = vmatpush.msra.mxu3 %v90_v30  ;;  %169 = vmatpush.msra.mxu2 %v73_v32  ;;  %v86_v49 = vld [vmem:[#allocation2 + $0x1a0] sm:$0xff]  ;;  %v69_v52 = vld [vmem:[#allocation2 + $0x118] sm:$0xff]  ;;  %108 = vst [vmem:[#allocation1 + $0x1] ss:$4 sm:$0xff] %v31_v47  ;;  %v68_v56 = vld [vmem:[#allocation2 + $0x110] sm:$0xff] }
  0x17   :  { %148 = vmatpush.msra.mxu1 %v58_v31  ;;  %129 = vmatpush.msra.mxu0 %v41_v33  ;;  %v54_v50 = vld [vmem:[#allocation2 + $0xa0] sm:$0xff]  ;;  %v37_v53 = vld [vmem:[#allocation2 + $0x18] sm:$0xff]  ;;  %110 = vst [vmem:[#allocation1 + $0x2] ss:$4 sm:$0xff] %v32_v48  ;;  %v36_v57 = vld [vmem:[#allocation2 + $0x10] sm:$0xff] }
  0x18   :  { %189 = vmatpush.msra.mxu3 %v89_v34  ;;  %170 = vmatpush.msra.mxu2 %v72_v36  ;;  %v85_v54 = vld [vmem:[#allocation2 + $0x198] sm:$0xff]  ;;  %112 = vst [vmem:[#allocation1 + $0x3] ss:$4 sm:$0xff] %v33_v51  ;;  %v84_v58 = vld [vmem:[#allocation2 + $0x190] sm:$0xff]  ;;  %v67_v60 = vld [vmem:[#allocation2 + $0x108] sm:$0xff] }
  0x19   :  { %149 = vmatpush.msra.mxu1 %v57_v35  ;;  %130 = vmatpush.msra.mxu0 %v40_v37  ;;  %v53_v55 = vld [vmem:[#allocation2 + $0x98] sm:$0xff]  ;;  %v52_v59 = vld [vmem:[#allocation2 + $0x90] sm:$0xff]  ;;  %v35_v61 = vld [vmem:[#allocation2 + $0x8] sm:$0xff] }
  0x1a   :  { %190 = vmatpush.msra.mxu3 %v88_v38  ;;  %171 = vmatpush.msra.mxu2 %v71_v40  ;;  %v83_v62 = vld [vmem:[#allocation2 + $0x188] sm:$0xff]  ;;  %v66_v0 = vld [vmem:[#allocation2 + $0x100] sm:$0xff]  ;;  %v255_v8 = vld [vmem:[%s330_s2] ss:$0 sm:$0xff] }
  0x1b   :  { %150 = vmatpush.msra.mxu1 %v56_v39  ;;  %131 = vmatpush.msra.mxu0 %v39_v41  ;;  %v51_v63 = vld [vmem:[#allocation2 + $0x88] sm:$0xff]  ;;  %v34_v1 = vld [vmem:[#allocation2] sm:$0xff] }
  0x1c   :  { %191 = vmatpush.msra.mxu3 %v87_v43  ;;  %172 = vmatpush.msra.mxu2 %v70_v42  ;;  %v82_v2 = vld [vmem:[#allocation2 + $0x180] sm:$0xff] }
  0x1d   :  { %151 = vmatpush.msra.mxu1 %v55_v45  ;;  %132 = vmatpush.msra.mxu0 %v38_v44  ;;  %v50_v3 = vld [vmem:[#allocation2 + $0x80] sm:$0xff] }
  0x1e   :  { %192 = vmatpush.msra.mxu3 %v86_v49  ;;  %173 = vmatpush.msra.mxu2 %v69_v52 }
  0x1f   :  { %152 = vmatpush.msra.mxu1 %v54_v50  ;;  %133 = vmatpush.msra.mxu0 %v37_v53  ;;  %v115_v4 = vld.sshfl [vmem:[#allocation1 + $0x10] sm:$0xff pattern:$0x73625140]  ;;  %v113_v5 = vld.sshfl [vmem:[#allocation1] sm:$0xff pattern:$0x73625140] }
  0x20   :  { %193 = vmatpush.msra.mxu3 %v85_v54  ;;  %174 = vmatpush.msra.mxu2 %v68_v56  ;;  %v116_v6 = vld.sshfl [vmem:[#allocation1 + $0x18] sm:$0xff pattern:$0x73625140]  ;;  %v114_v7 = vld.sshfl [vmem:[#allocation1 + $0x8] sm:$0xff pattern:$0x73625140] }
  0x21   :  { %153 = vmatpush.msra.mxu1 %v53_v55  ;;  %134 = vmatpush.msra.mxu0 %v36_v57 }
  0x22   :  { %194 = vmatpush.msra.mxu3 %v84_v58  ;;  %175 = vmatpush.msra.mxu2 %v67_v60 }
  0x23   :  { %154 = vmatpush.msra.mxu1 %v52_v59  ;;  %135 = vmatpush.msra.mxu0 %v35_v61 }
  0x24   :  { %195 = vmatpush.msra.mxu3 %v83_v62  ;;  %176 = vmatpush.msra.mxu2 %v66_v0 }
  0x25   :  { %155 = vmatpush.msra.mxu1 %v51_v63  ;;  %136 = vmatpush.msra.mxu0 %v34_v1 }
  0x26   :  { %177 = vmatmul.f32.vlgmr.msra.gmra.mxu2 %v115_v4  ;;  %196 = vmatpush.msra.mxu3 %v82_v2 }
  0x27   :  { %137 = vmatmul.f32.vlgmr.msra.gmra.mxu0 %v113_v5  ;;  %197 = vmatmul.f32.vlgmr.msra.gmra.mxu3 %v116_v6 }
  0x28   :  { %156 = vmatpush.msra.mxu1 %v50_v3 }
  0x29   :  { %157 = vmatmul.f32.vlgmr.msra.gmra.mxu1 %v114_v7 }
  0xa4   :  { %v138_v9 = vpop.f32.mrf.mxu0 }
  0xa5   :  { %v139_v10 = vadd.f32 %v255_v8, %v138_v9 }
  0xa6   :  { %v158_v11 = vpop.f32.mrf.mxu1 }
  0xa7   :  { %v159_v12 = vadd.f32 %v158_v11, %v139_v10 }
  0xa9   :  { %v178_v13 = vpop.f32.mrf.mxu2 }
  0xaa   :  { %v179_v14 = vadd.f32 %v178_v13, %v159_v12  ;;  %v198_v15 = vpop.f32.mrf.mxu3 }
  0xac   :  { %v199_v16 = vadd.f32 %v198_v15, %v179_v14 }
  0xae   :  { %v201_v17 = vmul.f32 %v199_v16, %v199_v16  ;;  %v205_v22 = vmul.f32 0.5, %v199_v16 }
  0xb0   :  { %v202_v18 = vmul.f32 0.035677407, %v201_v17 }
  0xb2   :  { %v203_v19 = vadd.f32 0.7978846, %v202_v18 }
  0xb4   :  { %v204_v20 = vmul.f32 %v203_v19, %v199_v16 }
  0xb6   :  { %256 = vtanh.f32 %v204_v20 }
  0xbc   :  { %v257_v21 = vpop.eup %256 }
  0xbd   :  { %v207_v23 = vadd.f32 1.0, %v257_v21 }
  0xbf   :  { %v208_v24 = vmul.f32 %v207_v23, %v205_v22 }
  0xc1   :  { %209 = vst [vmem:[#allocation4] sm:$0xff] %v208_v24 }
  0xc8   :  { %v228_v25 = vld [vmem:[#allocation4] sm:$0x3] }
  0xc9   :  { %229 = vst [vmem:[%s331_s3] sm:$0x3] %v228_v25 }
  0xca   :  { %247 = vsyncpa [#allocation3], 1 }

</bundles_post_ra>
